<compile_context>
chip_gen: v7x
topology: tpu7x:2x2x1
jax: 0.10.0
libtpu: 0.0.40
codegen_flags: <defaults>
</compile_context>

<pallas_src>
import functools

import jax
import jax.numpy as jnp
from jax import lax
from jax.experimental import pallas as pl
from jax.experimental.pallas import tpu as pltpu

EPS = 1e-5


def mlp_kernel(batch_ref, x_ref, *rest, num_graphs, num_layers):
    """Fused MLP forward. rest = (w0, b0, g0, be0, w1, b1, g1, be1, ..., out_ref)."""
    out_ref = rest[-1]
    param_refs = rest[:-1]

    n = x_ref.shape[0]

    # --- segment matrices (batch is layer-invariant; built once) -------------
    batch = batch_ref[...]                                           # [N, 1] int32
    graph_ids = lax.broadcasted_iota(jnp.int32, (n, num_graphs), 1)
    onehot = (batch == graph_ids).astype(jnp.float32)                # [N, B]

    counts = jnp.sum(onehot, axis=0, keepdims=True)                  # [1, B]
    inv_counts = 1.0 / jnp.maximum(counts, 1.0)                      # [1, B]
    onehot_nrm = onehot * inv_counts                                 # [N, B] col b = 1/|graph b|
    onehot_bf = onehot.astype(jnp.bfloat16)                          # exact (0/1)

    # --- layer loop: h never leaves VMEM --------------------------------------
    h_bf = x_ref[...]                                                # bf16 MXU operand
    h = None
    for layer in range(num_layers):
        w_ref, b_ref, g_ref, be_ref = param_refs[4 * layer:4 * layer + 4]

        # Linear (bf16 MXU operands, f32 accumulation) + ReLU
        z = jnp.dot(h_bf, w_ref[...], preferred_element_type=jnp.float32) + b_ref[...]
        h = jnp.maximum(z, 0.0)                                      # [N, C] f32

        # Per-graph InstanceNorm stats: two separate MXU reductions (no lane
        # concat). Kept as f32 operands deliberately: var = E[x^2] - mean^2 is
        # cancellation-prone for post-ReLU activations with mean >> std.
        mean = lax.dot_general(onehot_nrm, h, (((0,), (0,)), ((), ())),
                               preferred_element_type=jnp.float32)   # [B, C]
        ex2 = lax.dot_general(onehot_nrm, h * h, (((0,), (0,)), ((), ())),
                              preferred_element_type=jnp.float32)    # [B, C]
        var = jnp.maximum(ex2 - mean * mean, 0.0)                    # biased var (PyG)

        # Fold gamma/beta into per-graph scale/shift, broadcast with two bf16
        # MXU passes, then one fused multiply-add per node.
        scale_b = lax.rsqrt(var + EPS) * g_ref[...]                  # [B, C]
        shift_b = be_ref[...] - mean * scale_b                       # [B, C]
        scale_n = jnp.dot(onehot_bf, scale_b.astype(jnp.bfloat16),
                          preferred_element_type=jnp.float32)        # [N, C]
        shift_n = jnp.dot(onehot_bf, shift_b.astype(jnp.bfloat16),
                          preferred_element_type=jnp.float32)        # [N, C]
        h = h * scale_n + shift_n

        if layer + 1 < num_layers:
            h_bf = h.astype(jnp.bfloat16)                            # next layer's operand

    out_ref[...] = h.astype(out_ref.dtype)


def _vmem_limit_bytes():
    """Generation-aware VMEM budget with headroom (48 MiB on v7x, 96 MiB on v5e/v6e)."""
    cap = 64 * 1024 * 1024
    try:
        cap = int(pltpu.get_tpu_info().vmem_capacity_bytes)
    except Exception:
        pass
    return min((cap * 3) // 4, 100 * 1024 * 1024)


def mlp_forward(x, batch, params, num_graphs):
    """MLPModule.forward: all LinearModule layers fused into a single Pallas kernel."""
    n = x.shape[0]
    num_layers = len(params)
    c_out = params[-1][0].shape[1]
    c_pad = ((c_out + 127) // 128) * 128     # lane-dense output width

    flat_inputs = [batch.reshape(n, 1).astype(jnp.int32), x.astype(jnp.bfloat16)]
    for li, (w, b, gamma, beta) in enumerate(params):
        c = w.shape[1]
        if li == num_layers - 1 and c_pad != c:
            # Zero-pad the last layer's channels: padded lanes produce exact 0
            # (W/b pad = 0 -> h = 0; gamma pad = 0 -> scale = 0; beta pad = 0).
            p = c_pad - c
            w = jnp.pad(w, ((0, 0), (0, p)))
            b = jnp.pad(b, ((0, p),))
            gamma = jnp.pad(gamma, ((0, p),))
            beta = jnp.pad(beta, ((0, p),))
            c = c_pad
        flat_inputs += [
            w.astype(jnp.bfloat16),
            b.reshape(1, c).astype(jnp.float32),
            gamma.reshape(1, c).astype(jnp.float32),
            beta.reshape(1, c).astype(jnp.float32),
        ]

    kernel = functools.partial(mlp_kernel, num_graphs=num_graphs,
                               num_layers=num_layers)
    vmem = pl.BlockSpec(memory_space=pltpu.MemorySpace.VMEM)
    out = pl.pallas_call(
        kernel,
        out_shape=jax.ShapeDtypeStruct((n, c_pad), jnp.float32),
        in_specs=[vmem] * len(flat_inputs),
        out_specs=vmem,
        compiler_params=pltpu.CompilerParams(vmem_limit_bytes=_vmem_limit_bytes()),
    )(*flat_inputs)
    return out[:, :c_out]


def mlp_reference(x, batch, params, num_graphs):
    """Pure-JAX f32 reference of MLPModule (Linear -> ReLU -> PyG InstanceNorm)."""
    h = x.astype(jnp.float32)
    oh = (batch[:, None] == jnp.arange(num_graphs)[None, :]).astype(jnp.float32)
    cnt = jnp.maximum(oh.sum(0), 1.0)[:, None]
    for (w, b, gamma, beta) in params:
        h = jnp.maximum(h @ w + b, 0.0)
        mean = (oh.T @ h) / cnt
        var = (oh.T @ (h * h)) / cnt - mean ** 2
        scale = gamma / jnp.sqrt(var + EPS)
        shift = beta - mean * scale
        h = h * (oh @ scale) + (oh @ shift)
    return h


def init_params(key, channels):
    """Per layer i: Linear(channels[i-1] -> channels[i]) with PyTorch-style uniform
    init; InstanceNorm affine weight=1, bias=0."""
    params = []
    for i in range(1, len(channels)):
        cin, cout = channels[i - 1], channels[i]
        key, kw, kb = jax.random.split(key, 3)
        bound = 1.0 / (cin ** 0.5)
        w = jax.random.uniform(kw, (cin, cout), jnp.float32, -bound, bound)
        b = jax.random.uniform(kb, (cout,), jnp.float32, -bound, bound)
        gamma = jnp.ones((cout,), jnp.float32)
        beta = jnp.zeros((cout,), jnp.float32)
        params.append((w, b, gamma, beta))
    return params


if __name__ == "__main__":
    key = jax.random.PRNGKey(0)
    k_x, k_p = jax.random.split(key)

    # small shapes: 64 nodes split across 2 graphs, channels [16, 32, 32]
    N = 64
    NUM_GRAPHS = 2
    CHANNELS = [16, 32, 32]

    x = jax.random.normal(k_x, (N, CHANNELS[0]), jnp.float32)
    batch = jnp.concatenate([
        jnp.zeros((N // 2,), jnp.int32),
        jnp.ones((N - N // 2,), jnp.int32),
    ])
    params = init_params(k_p, CHANNELS)

    out = mlp_forward(x, batch, params, NUM_GRAPHS)
    jax.block_until_ready(out)

    assert out.shape == (N, CHANNELS[-1]), out.shape
    assert jnp.all(jnp.isfinite(out))

    # bf16 MXU operands => loose tolerance vs the f32 reference.
    ref = mlp_reference(x, batch, params, NUM_GRAPHS)
    max_err = float(jnp.max(jnp.abs(out - ref)))
    assert max_err < 1e-1, f"max abs error vs f32 reference: {max_err}"

    print("KERNEL_OK")
</pallas_src>

<mosaic_0001>
module attributes {stable_mosaic.version = 11 : i64} {
  func.func @mlp_kernel(%arg0: memref<64x1xi32, #tpu.memory_space<vmem>>, %arg1: memref<64x16xbf16, #tpu.memory_space<vmem>>, %arg2: memref<16x32xbf16, #tpu.memory_space<vmem>>, %arg3: memref<1x32xf32, #tpu.memory_space<vmem>>, %arg4: memref<1x32xf32, #tpu.memory_space<vmem>>, %arg5: memref<1x32xf32, #tpu.memory_space<vmem>>, %arg6: memref<32x128xbf16, #tpu.memory_space<vmem>>, %arg7: memref<1x128xf32, #tpu.memory_space<vmem>>, %arg8: memref<1x128xf32, #tpu.memory_space<vmem>>, %arg9: memref<1x128xf32, #tpu.memory_space<vmem>>, %arg10: memref<64x128xf32, #tpu.memory_space<vmem>>) attributes {dimension_semantics = [], scalar_prefetch = 0 : i64, scratch_operands = 0 : i64, tpu.core_type = #tpu.core_type<tc>} {
    %c0 = arith.constant 0 : index
    %c0_0 = arith.constant 0 : index
    %0 = vector.load %arg0[%c0, %c0_0] : memref<64x1xi32, #tpu.memory_space<vmem>>, vector<64x1xi32>
    %1 = tpu.iota {dimensions = array<i32: 1>} : vector<64x2xi32>
    %2 = vector.broadcast %0 : vector<64x1xi32> to vector<64x2xi32>
    %3 = arith.cmpi eq, %2, %1 : vector<64x2xi32>
    %4 = arith.extui %3 : vector<64x2xi1> to vector<64x2xi32>
    %5 = arith.sitofp %4 : vector<64x2xi32> to vector<64x2xf32>
    %cst = arith.constant dense<0.000000e+00> : vector<2xf32>
    %6 = vector.multi_reduction <add>, %5, %cst [0] : vector<64x2xf32> to vector<2xf32>
    %7 = vector.shape_cast %6 : vector<2xf32> to vector<1x2xf32>
    %cst_1 = arith.constant 1.000000e+00 : f32
    %8 = vector.broadcast %cst_1 : f32 to vector<1x2xf32>
    %9 = arith.maximumf %7, %8 : vector<1x2xf32>
    %cst_2 = arith.constant 1.000000e+00 : f32
    %10 = vector.broadcast %cst_2 : f32 to vector<1x2xf32>
    %11 = arith.divf %10, %9 : vector<1x2xf32>
    %12 = vector.broadcast %11 : vector<1x2xf32> to vector<64x2xf32>
    %13 = arith.mulf %5, %12 : vector<64x2xf32>
    %14 = arith.truncf %5 : vector<64x2xf32> to vector<64x2xbf16>
    %c0_3 = arith.constant 0 : index
    %c0_4 = arith.constant 0 : index
    %15 = vector.load %arg1[%c0_3, %c0_4] : memref<64x16xbf16, #tpu.memory_space<vmem>>, vector<64x16xbf16>
    %c0_5 = arith.constant 0 : index
    %c0_6 = arith.constant 0 : index
    %16 = vector.load %arg2[%c0_5, %c0_6] : memref<16x32xbf16, #tpu.memory_space<vmem>>, vector<16x32xbf16>
    %cst_7 = arith.constant dense<0.000000e+00> : vector<64x32xf32>
    %17 = tpu.matmul %15, %16, %cst_7 {dimension_numbers = #tpu.dot_dimension_numbers<[1], [0], [0], [1], [0, 0, 1, 1], [], []>} : vector<64x16xbf16>, vector<16x32xbf16>, vector<64x32xf32> -> vector<64x32xf32>
    %c0_8 = arith.constant 0 : index
    %c0_9 = arith.constant 0 : index
    %18 = vector.load %arg3[%c0_8, %c0_9] : memref<1x32xf32, #tpu.memory_space<vmem>>, vector<1x32xf32>
    %19 = vector.broadcast %18 : vector<1x32xf32> to vector<64x32xf32>
    %20 = arith.addf %17, %19 : vector<64x32xf32>
    %cst_10 = arith.constant 0.000000e+00 : f32
    %21 = vector.broadcast %cst_10 : f32 to vector<64x32xf32>
    %22 = arith.maximumf %20, %21 : vector<64x32xf32>
    %cst_11 = arith.constant dense<0.000000e+00> : vector<2x32xf32>
    %23 = tpu.matmul %13, %22, %cst_11 {dimension_numbers = #tpu.dot_dimension_numbers<[0], [0], [1], [1], [0, 1, 1, 1], [], []>} : vector<64x2xf32>, vector<64x32xf32>, vector<2x32xf32> -> vector<2x32xf32>
    %24 = arith.mulf %22, %22 : vector<64x32xf32>
    %cst_12 = arith.constant dense<0.000000e+00> : vector<2x32xf32>
    %25 = tpu.matmul %13, %24, %cst_12 {dimension_numbers = #tpu.dot_dimension_numbers<[0], [0], [1], [1], [0, 1, 1, 1], [], []>} : vector<64x2xf32>, vector<64x32xf32>, vector<2x32xf32> -> vector<2x32xf32>
    %26 = arith.mulf %23, %23 : vector<2x32xf32>
    %27 = arith.subf %25, %26 : vector<2x32xf32>
    %cst_13 = arith.constant 0.000000e+00 : f32
    %28 = vector.broadcast %cst_13 : f32 to vector<2x32xf32>
    %29 = arith.maximumf %27, %28 : vector<2x32xf32>
    %cst_14 = arith.constant 9.99999974E-6 : f32
    %30 = vector.broadcast %cst_14 : f32 to vector<2x32xf32>
    %31 = arith.addf %29, %30 : vector<2x32xf32>
    %32 = math.rsqrt %31 : vector<2x32xf32>
    %c0_15 = arith.constant 0 : index
    %c0_16 = arith.constant 0 : index
    %33 = vector.load %arg4[%c0_15, %c0_16] : memref<1x32xf32, #tpu.memory_space<vmem>>, vector<1x32xf32>
    %34 = vector.broadcast %33 : vector<1x32xf32> to vector<2x32xf32>
    %35 = arith.mulf %32, %34 : vector<2x32xf32>
    %c0_17 = arith.constant 0 : index
    %c0_18 = arith.constant 0 : index
    %36 = vector.load %arg5[%c0_17, %c0_18] : memref<1x32xf32, #tpu.memory_space<vmem>>, vector<1x32xf32>
    %37 = arith.mulf %23, %35 : vector<2x32xf32>
    %38 = vector.broadcast %36 : vector<1x32xf32> to vector<2x32xf32>
    %39 = arith.subf %38, %37 : vector<2x32xf32>
    %40 = arith.truncf %35 : vector<2x32xf32> to vector<2x32xbf16>
    %cst_19 = arith.constant dense<0.000000e+00> : vector<64x32xf32>
    %41 = tpu.matmul %14, %40, %cst_19 {dimension_numbers = #tpu.dot_dimension_numbers<[1], [0], [0], [1], [0, 0, 1, 1], [], []>} : vector<64x2xbf16>, vector<2x32xbf16>, vector<64x32xf32> -> vector<64x32xf32>
    %42 = arith.truncf %39 : vector<2x32xf32> to vector<2x32xbf16>
    %cst_20 = arith.constant dense<0.000000e+00> : vector<64x32xf32>
    %43 = tpu.matmul %14, %42, %cst_20 {dimension_numbers = #tpu.dot_dimension_numbers<[1], [0], [0], [1], [0, 0, 1, 1], [], []>} : vector<64x2xbf16>, vector<2x32xbf16>, vector<64x32xf32> -> vector<64x32xf32>
    %44 = arith.mulf %22, %41 : vector<64x32xf32>
    %45 = arith.addf %44, %43 : vector<64x32xf32>
    %46 = arith.truncf %45 : vector<64x32xf32> to vector<64x32xbf16>
    %c0_21 = arith.constant 0 : index
    %c0_22 = arith.constant 0 : index
    %47 = vector.load %arg6[%c0_21, %c0_22] : memref<32x128xbf16, #tpu.memory_space<vmem>>, vector<32x128xbf16>
    %cst_23 = arith.constant dense<0.000000e+00> : vector<64x128xf32>
    %48 = tpu.matmul %46, %47, %cst_23 {dimension_numbers = #tpu.dot_dimension_numbers<[1], [0], [0], [1], [0, 0, 1, 1], [], []>} : vector<64x32xbf16>, vector<32x128xbf16>, vector<64x128xf32> -> vector<64x128xf32>
    %c0_24 = arith.constant 0 : index
    %c0_25 = arith.constant 0 : index
    %49 = vector.load %arg7[%c0_24, %c0_25] : memref<1x128xf32, #tpu.memory_space<vmem>>, vector<1x128xf32>
    %50 = vector.broadcast %49 : vector<1x128xf32> to vector<64x128xf32>
    %51 = arith.addf %48, %50 : vector<64x128xf32>
    %cst_26 = arith.constant 0.000000e+00 : f32
    %52 = vector.broadcast %cst_26 : f32 to vector<64x128xf32>
    %53 = arith.maximumf %51, %52 : vector<64x128xf32>
    %cst_27 = arith.constant dense<0.000000e+00> : vector<2x128xf32>
    %54 = tpu.matmul %13, %53, %cst_27 {dimension_numbers = #tpu.dot_dimension_numbers<[0], [0], [1], [1], [0, 1, 1, 1], [], []>} : vector<64x2xf32>, vector<64x128xf32>, vector<2x128xf32> -> vector<2x128xf32>
    %55 = arith.mulf %53, %53 : vector<64x128xf32>
    %cst_28 = arith.constant dense<0.000000e+00> : vector<2x128xf32>
    %56 = tpu.matmul %13, %55, %cst_28 {dimension_numbers = #tpu.dot_dimension_numbers<[0], [0], [1], [1], [0, 1, 1, 1], [], []>} : vector<64x2xf32>, vector<64x128xf32>, vector<2x128xf32> -> vector<2x128xf32>
    %57 = arith.mulf %54, %54 : vector<2x128xf32>
    %58 = arith.subf %56, %57 : vector<2x128xf32>
    %cst_29 = arith.constant 0.000000e+00 : f32
    %59 = vector.broadcast %cst_29 : f32 to vector<2x128xf32>
    %60 = arith.maximumf %58, %59 : vector<2x128xf32>
    %cst_30 = arith.constant 9.99999974E-6 : f32
    %61 = vector.broadcast %cst_30 : f32 to vector<2x128xf32>
    %62 = arith.addf %60, %61 : vector<2x128xf32>
    %63 = math.rsqrt %62 : vector<2x128xf32>
    %c0_31 = arith.constant 0 : index
    %c0_32 = arith.constant 0 : index
    %64 = vector.load %arg8[%c0_31, %c0_32] : memref<1x128xf32, #tpu.memory_space<vmem>>, vector<1x128xf32>
    %65 = vector.broadcast %64 : vector<1x128xf32> to vector<2x128xf32>
    %66 = arith.mulf %63, %65 : vector<2x128xf32>
    %c0_33 = arith.constant 0 : index
    %c0_34 = arith.constant 0 : index
    %67 = vector.load %arg9[%c0_33, %c0_34] : memref<1x128xf32, #tpu.memory_space<vmem>>, vector<1x128xf32>
    %68 = arith.mulf %54, %66 : vector<2x128xf32>
    %69 = vector.broadcast %67 : vector<1x128xf32> to vector<2x128xf32>
    %70 = arith.subf %69, %68 : vector<2x128xf32>
    %71 = arith.truncf %66 : vector<2x128xf32> to vector<2x128xbf16>
    %cst_35 = arith.constant dense<0.000000e+00> : vector<64x128xf32>
    %72 = tpu.matmul %14, %71, %cst_35 {dimension_numbers = #tpu.dot_dimension_numbers<[1], [0], [0], [1], [0, 0, 1, 1], [], []>} : vector<64x2xbf16>, vector<2x128xbf16>, vector<64x128xf32> -> vector<64x128xf32>
    %73 = arith.truncf %70 : vector<2x128xf32> to vector<2x128xbf16>
    %cst_36 = arith.constant dense<0.000000e+00> : vector<64x128xf32>
    %74 = tpu.matmul %14, %73, %cst_36 {dimension_numbers = #tpu.dot_dimension_numbers<[1], [0], [0], [1], [0, 0, 1, 1], [], []>} : vector<64x2xbf16>, vector<2x128xbf16>, vector<64x128xf32> -> vector<64x128xf32>
    %75 = arith.mulf %53, %72 : vector<64x128xf32>
    %76 = arith.addf %75, %74 : vector<64x128xf32>
    %c0_37 = arith.constant 0 : index
    %c0_38 = arith.constant 0 : index
    %77 = vector.load %arg10[%c0_37, %c0_38] : memref<64x128xf32, #tpu.memory_space<vmem>>, vector<64x128xf32>
    tpu.vector_store %arg10[%c0_37, %c0_38], %76 {strides = array<i32>} : memref<64x128xf32, #tpu.memory_space<vmem>>, vector<64x128xf32>,
    return
  }
}

</mosaic_0001>

<bundles_post_ra>
// kernel: tpu_custom_call.1
= control target key start
LH: loop header
LB: loop body
LE: loop exit
PB: predicated region body
PF: predicated region fallthrough
CT: control target
= control target key end

     0   :  { %v1450_v2 = vmov 0   ;;  %vm175_vm0 = vcmask 130048   ;;  %s1790_s0 = inlined_call_operand.vmem [shape: s32[64,1], index: 0, kind: input, shape index: {}]   ;;  %s1791_s1 = inlined_call_operand.vmem [shape: bf16[64,16], index: 1, kind: input, shape index: {}]   ;;  %s1792_s2 = inlined_call_operand.vmem [shape: bf16[16,32], index: 2, kind: input, shape index: {}]   ;;  %s1793_s3 = inlined_call_operand.vmem [shape: f32[1,32], index: 3, kind: input, shape index: {}]   ;;  %s1794_s4 = inlined_call_operand.vmem [shape: f32[1,32], index: 4, kind: input, shape index: {}]   ;;  %s1795_s5 = inlined_call_operand.vmem [shape: f32[1,32], index: 5, kind: input, shape index: {}]   ;;  %s1796_s6 = inlined_call_operand.vmem [shape: bf16[32,128], index: 6, kind: input, shape index: {}]   ;;  %s1797_s7 = inlined_call_operand.vmem [shape: f32[1,128], index: 7, kind: input, shape index: {}]   ;;  %s1798_s8 = inlined_call_operand.vmem [shape: f32[1,128], index: 8, kind: input, shape index: {}]   ;;  %s1799_s9 = inlined_call_operand.vmem [shape: f32[1,128], index: 9, kind: input, shape index: {}]   ;;  %s1800_s10 = inlined_call_operand.hbm [shape: f32[64,128], index: 10, kind: output, shape index: {}]  }
   0x1   :  { %v39_v0 = vld [vmem:[%s1790_s0 + $0x10] sm:$0xff]  ;;  %v37_v1 = vld [vmem:[%s1790_s0] sm:$0xff]  ;;  %1412 = vset.pattern.permute.xlu1 %v1450_v2  ;;  %1411 = vset.pattern.permute.xlu0 %v1450_v2  ;;  %v40_v3 = vld [vmem:[%s1790_s0 + $0x18] sm:$0xff] }
   0x2   :  { %54 = vperm.xlu1 %1412, %v39_v0   ;;  %48 = vperm.xlu0 %1411, %v37_v1   ;;  %v38_v4 = vld [vmem:[%s1790_s0 + $0x8] sm:$0xff]  ;;  %v1413_v5 = vld [vmem:[%s1792_s2] sm:$0xff]   ;;  %v1416_v10 = vld [vmem:[%s1791_s1 + $0x10] sm:$0xff]  }
   0x3   :  { %v1414_v6 = vld [vmem:[%s1791_s1] sm:$0xff]   ;;  %v42_v7 = vld [vmem:[%s1790_s0 + $0x28] sm:$0xff]  ;;  %1211 = vmatprep.subr.bf16.mxu0 %v1413_v5 }
   0x4   :  { %v41_v8 = vld [vmem:[%s1790_s0 + $0x20] sm:$0xff]  ;;  %v1415_v9 = vld [vmem:[%s1791_s1 + $0x8] sm:$0xff]   ;;  %1212 = vmatpush3.bf16.msra.mxu0 %v1413_v5  ;;  %1213 = vmatprep.mubr.msk.bf16.mxu0 %vm175_vm0, %v1414_v6 }
   0x6   :  { %57 = vperm.xlu1 %1412, %v40_v3   ;;  %51 = vperm.xlu0 %1411, %v38_v4  }
   0x7   :  { %15 = vsyncpa [#allocation3], 0  ;;  %v44_v11 = vld [vmem:[%s1790_s0 + $0x38] sm:$0xff]  ;;  %v43_v12 = vld [vmem:[%s1790_s0 + $0x30] sm:$0xff]  ;;  %1214 = vmatmul.mubr.msk.bf16.vlgmr.msra.gmra.mrb[0].mxu0 %vm175_vm0, %v1415_v9  ;;  %v1451_v14 = vmov 0.0|0.0   ;;  %vm1452_vm1 = vmmov 0   ;;  %v45_v16 = vlaneseq }
   0x8   :  { %1217 = vmatprep.mubr.msk.bf16.mxu0 %vm175_vm0, %v1416_v10  ;;  %v1417_v13 = vld [vmem:[%s1791_s1 + $0x18] sm:$0xff]   ;;  %1349 = vmatprep.subr.bf16.mxu1 %v1451_v14  ;;  %v1453_v15 = vmov 0.0   ;;  %vm95_vm4 = vcmask 15360   ;;  %v1103_v5 = vld [vmem:[%s1793_s3] ss:$0 sm:$0xff]  ;;  %vm293_vm11 = vcmask 523264  }
   0x9   :  { %1361 = vmatprep.subr.bf16.mxu0 %v1451_v14  ;;  %1237 = vmatprep.mubr.msk.f32.mxu1 %vm1452_vm1, %v1453_v15  ;;  %v46_v17 = vand.u32 127, %v45_v16  ;;  %vm480_vm12 = vcmask 1040384   ;;  %vm661_vm13 = vcmask 261120  }
   0xa   :  { %63 = vperm.xlu1 %1412, %v42_v7   ;;  %60 = vperm.xlu0 %1411, %v41_v8  }
   0xe   :  { %69 = vperm.xlu1 %1412, %v44_v11   ;;  %66 = vperm.xlu0 %1411, %v43_v12  }
   0xf   :  { %1218 = vmatmul.mubr.msk.bf16.gmra.mrb[4].mxu0 %vm175_vm0, %v1417_v13 }
  0x10   :  { %1256 = vmatprep.mubr.msk.f32.mxu0 %vm1452_vm1, %v1453_v15 }
  0x81   :  { %v55_v18 = vpop.permute.xlu1 %54  ;;  %v49_v19 = vpop.permute.xlu0 %48 }
  0x82   :  { %vm73_vm2 = vcmp.eq.s32.totalorder %v55_v18, %v46_v17  ;;  %vm71_vm3 = vcmp.eq.s32.totalorder %v49_v19, %v46_v17 }
  0x83   :  { %v1097_v20 = vsel %vm73_vm2, 1.0, %v1453_v15  ;;  %v1095_v21 = vsel %vm71_vm3, 1.0, %v1453_v15 }
  0x84   :  { %v96_v26 = vsel %vm95_vm4, %v1095_v21, 0.0  ;;  %v99_v33 = vsel %vm95_vm4, %v1097_v20, 0.0 }
  0x85   :  { %v58_v22 = vpop.permute.xlu1 %57  ;;  %v52_v23 = vpop.permute.xlu0 %51 }
  0x86   :  { %vm74_vm5 = vcmp.eq.s32.totalorder %v58_v22, %v46_v17  ;;  %vm72_vm6 = vcmp.eq.s32.totalorder %v52_v23, %v46_v17 }
  0x87   :  { %v1098_v24 = vsel %vm74_vm5, 1.0, %v1453_v15  ;;  %v1096_v25 = vsel %vm72_vm6, 1.0, %v1453_v15 }
  0x88   :  { %v1566_v27 = vpack.c.bf16 %v1098_v24, %v1097_v20  ;;  %v97_v28 = vsel %vm95_vm4, %v1096_v25, 0.0  ;;  %v1569_v29 = vpack.c.bf16 %v1096_v25, %v1095_v21  ;;  %v101_v37 = vsel %vm95_vm4, %v1098_v24, 0.0 }
  0x89   :  { %v98_v30 = vadd.f32 %v97_v28, %v96_v26  ;;  %v64_v31 = vpop.permute.xlu1 %63  ;;  %v61_v32 = vpop.permute.xlu0 %60 }
  0x8a   :  { %vm76_vm7 = vcmp.eq.s32.totalorder %v64_v31, %v46_v17  ;;  %vm75_vm8 = vcmp.eq.s32.totalorder %v61_v32, %v46_v17 }
  0x8b   :  { %v100_v34 = vadd.f32 %v99_v33, %v98_v30  ;;  %v1100_v35 = vsel %vm76_vm7, 1.0, %v1453_v15  ;;  %v1099_v36 = vsel %vm75_vm8, 1.0, %v1453_v15 }
  0x8c   :  { %v1575_v38 = vpack.c.bf16 %v1100_v35, %v1099_v36  ;;  %v103_v42 = vsel %vm95_vm4, %v1099_v36, 0.0  ;;  %v105_v46 = vsel %vm95_vm4, %v1100_v35, 0.0 }
  0x8d   :  { %v102_v39 = vadd.f32 %v101_v37, %v100_v34  ;;  %v70_v40 = vpop.permute.xlu1 %69  ;;  %v67_v41 = vpop.permute.xlu0 %66 }
  0x8e   :  { %vm78_vm9 = vcmp.eq.s32.totalorder %v70_v40, %v46_v17  ;;  %vm77_vm10 = vcmp.eq.s32.totalorder %v67_v41, %v46_v17 }
  0x8f   :  { %v104_v43 = vadd.f32 %v103_v42, %v102_v39  ;;  %v1102_v44 = vsel %vm78_vm9, 1.0, %v1453_v15  ;;  %v1101_v45 = vsel %vm77_vm10, 1.0, %v1453_v15 }
  0x90   :  { %v1581_v47 = vpack.c.bf16 %v1102_v44, %v1101_v45  ;;  %v107_v49 = vsel %vm95_vm4, %v1101_v45, 0.0  ;;  %v109_v51 = vsel %vm95_vm4, %v1102_v44, 0.0 }
  0x91   :  { %v106_v48 = vadd.f32 %v105_v46, %v104_v43 }
  0x93   :  { %v108_v50 = vadd.f32 %v107_v49, %v106_v48 }
  0x95   :  { %v110_v52 = vadd.f32 %v109_v51, %v108_v50 }
  0x97   :  { %v111_v53 = vrot.slane %v110_v52, 4 }
  0x99   :  { %v112_v54 = vadd.f32 %v111_v53, %v110_v52 }
  0x9b   :  { %v113_v55 = vrot.slane %v112_v54, 2 }
  0x9d   :  { %v114_v56 = vadd.f32 %v113_v55, %v112_v54 }
  0x9f   :  { %v115_v57 = vrot.slane %v114_v56, 1 }
  0xa1   :  { %v116_v58 = vadd.f32 %v115_v57, %v114_v56 }
  0xa3   :  { %v117_v59 = vmax.f32 %v116_v58, 1.0 }
  0xa5   :  { %1420 = vrcp.f32 %v117_v59 }
  0xaf   :  { %v1421_v60 = vpop.eup %1420 }
  0xb0   :  { %v120_v61 = vmul.f32 %v1421_v60, %v1095_v21  ;;  %v121_v62 = vmul.f32 %v1421_v60, %v1096_v25  ;;  %v122_v63 = vmul.f32 %v1421_v60, %v1097_v20  ;;  %v123_v0 = vmul.f32 %v1421_v60, %v1098_v24 }
  0xb1   :  { %v124_v1 = vmul.f32 %v1421_v60, %v1099_v36  ;;  %v125_v2 = vmul.f32 %v1421_v60, %v1100_v35  ;;  %v126_v3 = vmul.f32 %v1421_v60, %v1101_v45  ;;  %v127_v4 = vmul.f32 %v1421_v60, %v1102_v44 }
  0xb2   :  { %261 = vxpose.xlu0.b32.start [1/8] (short) (narrow) %v120_v61, 8  ;;  %v1115_v61 = vld [vmem:[%s1794_s4] ss:$0 sm:$0xff] }
  0xb6   :  { %262 = vxpose.xlu0.b32.cont [2/8] (short) (narrow) %v121_v62, 8 }
  0xba   :  { %263 = vxpose.xlu0.b32.cont [3/8] (short) (narrow) %v122_v63, 8 }
  0xbe   :  { %264 = vxpose.xlu0.b32.cont [4/8] (short) (narrow) %v123_v0, 8  ;;  %v1116_v0 = vld [vmem:[%s1795_s5] ss:$0 sm:$0xff] }
  0xc2   :  { %265 = vxpose.xlu0.b32.cont [5/8] (short) (narrow) %v124_v1, 8 }
  0xc6   :  { %266 = vxpose.xlu0.b32.cont [6/8] (short) (narrow) %v125_v2, 8 }
  0xca   :  { %267 = vxpose.xlu0.b32.cont [7/8] (short) (narrow) %v126_v3, 8 }
  0xce   :  { %268 = vxpose.xlu0.b32.end [8/8] (short) (narrow) %v127_v4, 8 }
  0xda   :  { %v1215_v6 = vpop.f32.mrb[0].mxu0 }
  0xdb   :  { %v231_v7 = vadd.f32 %v1215_v6, %v1103_v5  ;;  %v222_v8 = vpop.f32.mrb[1].mxu0 }
  0xdc   :  { %v223_v9 = vadd.f32 %v1103_v5, %v222_v8  ;;  %v1216_v10 = vpop.f32.mrb[2].mxu0  ;;  %v1419_v8 = vld [vmem:[%s1796_s6 + $0x8] sm:$0xff]  }
  0xdd   :  { %v234_v11 = vadd.f32 %v1216_v10, %v1103_v5  ;;  %v225_v12 = vpop.f32.mrb[3].mxu0  ;;  %v1588_v13 = vmax.f32 %v231_v7, 0.0  ;;  %v1418_v7 = vld [vmem:[%s1796_s6] sm:$0xff]  }
  0xde   :  { %v1590_v16 = vmax.f32 %v223_v9, 0.0  ;;  %v226_v17 = vadd.f32 %v1103_v5, %v225_v12 }
  0xdf   :  { %v1592_v18 = vmax.f32 %v234_v11, 0.0  ;;  %v369_v21 = vmul.f32 %v1588_v13, %v1588_v13 }
  0xe0   :  { %v367_v19 = vmul.f32 %v1590_v16, %v1590_v16  ;;  %v1596_v20 = vmax.f32 %v226_v17, 0.0 }
  0xe1   :  { %v370_v22 = vmul.f32 %v1592_v18, %v1592_v18  ;;  %v1353_v33 = vpack.c.bf16 %v1592_v18, %v1588_v13 }
  0xe2   :  { %v368_v23 = vmul.f32 %v1596_v20, %v1596_v20  ;;  %v1219_v24 = vpop.f32.mrb[4].mxu0  ;;  %v1350_v25 = vpack.c.bf16 %v1596_v20, %v1590_v16 }
  0xe3   :  { %v247_v26 = vadd.f32 %v1219_v24, %v1103_v5  ;;  %v238_v28 = vpop.f32.mrb[5].mxu0  ;;  %v1365_v40 = vpack.c.bf16 %v370_v22, %v369_v21 }
  0xe4   :  { %v239_v30 = vadd.f32 %v1103_v5, %v238_v28  ;;  %v1220_v31 = vpop.f32.mrb[6].mxu0  ;;  %1351 = vmatpush3.bf16.msra.mxu1 %v1350_v25  ;;  %v1362_v32 = vpack.c.bf16 %v368_v23, %v367_v19 }
  0xe5   :  { %v250_v34 = vadd.f32 %v1220_v31, %v1103_v5  ;;  %v241_v35 = vpop.f32.mrb[7].mxu0  ;;  %1352 = vmatprep.subr.bf16.mxu1 %v1451_v14  ;;  %v1609_v36 = vmax.f32 %v247_v26, 0.0 }
  0xe6   :  { %v1611_v37 = vmax.f32 %v239_v30, 0.0  ;;  %v242_v39 = vadd.f32 %v1103_v5, %v241_v35  ;;  %1363 = vmatpush3.bf16.msra.mxu0 %v1362_v32 }
  0xe7   :  { %v1613_v41 = vmax.f32 %v250_v34, 0.0  ;;  %1364 = vmatprep.subr.bf16.mxu0 %v1451_v14  ;;  %v373_v44 = vmul.f32 %v1609_v36, %v1609_v36 }
  0xe8   :  { %v371_v42 = vmul.f32 %v1611_v37, %v1611_v37  ;;  %v1618_v43 = vmax.f32 %v242_v39, 0.0  ;;  %1354 = vmatpush3.bf16.msra.mxu1 %v1353_v33 }
  0xe9   :  { %1355 = vmatprep.subr.bf16.mxu1 %v1451_v14  ;;  %v374_v45 = vmul.f32 %v1613_v41, %v1613_v41  ;;  %v1359_v50 = vpack.c.bf16 %v1613_v41, %v1609_v36 }
  0xea   :  { %v372_v46 = vmul.f32 %v1618_v43, %v1618_v43  ;;  %1366 = vmatpush3.bf16.msra.mxu0 %v1365_v40  ;;  %v1356_v48 = vpack.c.bf16 %v1618_v43, %v1611_v37 }
  0xeb   :  { %1367 = vmatprep.subr.bf16.mxu0 %v1451_v14  ;;  %v1371_v51 = vpack.c.bf16 %v374_v45, %v373_v44 }
  0xec   :  { %1357 = vmatpush3.bf16.msra.mxu1 %v1356_v48  ;;  %v1368_v49 = vpack.c.bf16 %v372_v46, %v371_v42 }
  0xed   :  { %1358 = vmatprep.subr.bf16.mxu1 %v1451_v14 }
  0xee   :  { %1369 = vmatpush3.bf16.msra.mxu0 %v1368_v49 }
  0xef   :  { %1370 = vmatprep.subr.bf16.mxu0 %v1451_v14 }
  0xf0   :  { %1360 = vmatpush3.bf16.msra.mxu1 %v1359_v50 }
  0xf2   :  { %1372 = vmatpush3.bf16.msra.mxu0 %v1371_v51 }
 0x132   :  { %v1634_v52 = vpop.trf.xlu0 }
 0x133   :  { %1238 = vmatmul.mubr.msk.f32.vlgmr.msra.gmra.mrb[0].mxu1 %vm293_vm11, %v1634_v52  ;;  %1257 = vmatmul.mubr.msk.f32.vlgmr.msra.gmra.mrb[8].mxu0 %vm293_vm11, %v1634_v52 }
 0x134   :  { %1261 = vmatprep.mubr.msk.bf16.mxu0 %vm95_vm4, %v1569_v29  ;;  %1265 = vmatprep.mubr.msk.bf16.mxu1 %vm95_vm4, %v1575_v38 }
 0x206   :  { %v363_v53 = vpop.f32.mrb[0].mxu1  ;;  %v441_v54 = vpop.f32.mrb[8].mxu0 }
 0x207   :  { %v445_v55 = vmul.f32 %v363_v53, %v363_v53  ;;  %v1239_v56 = vpop.f32.mrb[1].mxu1  ;;  %v1258_v57 = vpop.f32.mrb[9].mxu0 }
 0x209   :  { %v446_v58 = vsub.f32 %v441_v54, %v445_v55 }
 0x20b   :  { %v447_v59 = vmax.f32 %v446_v58, 0.0 }
 0x20d   :  { %v448_v60 = vadd.f32 1e-05, %v447_v59 }
 0x20f   :  { %1422 = vrsqrt.f32 %v448_v60 }
 0x219   :  { %v1423_v62 = vpop.eup %1422 }
 0x21a   :  { %v457_v63 = vmul.f32 %v1423_v62, %v1115_v61 }
 0x21c   :  { %v467_v1 = vpack.c.bf16 %v457_v63, %v457_v63  ;;  %v459_v2 = vmul.f32 %v457_v63, %v363_v53 }
 0x21e   :  { %1399 = vmatprep.subr.msk.bf16.mxu0 %vm480_vm12, %v467_v1  ;;  %1400 = vmatprep.subr.msk.bf16.mxu1 %vm480_vm12, %v467_v1  ;;  %v482_v3 = vsel %vm480_vm12, %v467_v1, 0  ;;  %v466_v4 = vsub.f32 %v1116_v0, %v459_v2 }
 0x21f   :  { %1260 = vmatpush3.bf16.msra.mxu0 %v482_v3  ;;  %1398 = vmatpush3.bf16.msra.mxu1 %v482_v3 }
 0x220   :  { %v549_v5 = vpack.c.bf16 %v466_v4, %v466_v4  ;;  %1279 = vmatprep.subr.bf16.mxu1 %v1418_v7 }
 0x222   :  { %1262 = vmatmul.mubr.msk.bf16.vlgmr.msra.gmra.mrb[12].mxu0 %vm95_vm4, %v1566_v27  ;;  %1266 = vmatmul.mubr.msk.bf16.vlgmr.msra.gmra.mrb[4].mxu1 %vm95_vm4, %v1581_v47  ;;  %v551_v6 = vsel %vm480_vm12, %v549_v5, 0 }
 0x223   :  { %1401 = vmatprep.subr.msk.bf16.mxu0 %vm480_vm12, %v549_v5  ;;  %1271 = vmatprep.mubr.msk.bf16.mxu0 %vm95_vm4, %v1569_v29 }
 0x224   :  { %1270 = vmatpush3.bf16.msra.mxu0 %v551_v6  ;;  %1280 = vmatpush3.bf16.msra.mxu1 %v1418_v7 }
 0x225   :  { %1373 = vmatprep.subr.bf16.mxu0 %v1451_v14  ;;  %1281 = vmatprep.subr.bf16.mxu1 %v1419_v8 }
 0x228   :  { %1282 = vmatpush3.bf16.msra.mxu1 %v1419_v8 }
 0x229   :  { %1385 = vmatprep.subr.bf16.mxu1 %v1451_v14 }
 0x22a   :  { %1272 = vmatmul.mubr.msk.bf16.vlgmr.msra.gmra.mrb[16].mxu0 %vm95_vm4, %v1566_v27 }
 0x22b   :  { %1275 = vmatprep.mubr.msk.bf16.mxu0 %vm95_vm4, %v1575_v38 }
 0x232   :  { %1276 = vmatmul.mubr.msk.bf16.gmra.mrb[20].mxu0 %vm95_vm4, %v1581_v47 }
 0x233   :  { %1307 = vmatprep.mubr.msk.f32.mxu0 %vm1452_vm1, %v1453_v15 }
 0x2f5   :  { %v1263_v9 = vpop.f32.mrb[12].mxu0  ;;  %v1267_v10 = vpop.f32.mrb[4].mxu1 }
 0x2f6   :  { %v518_v11 = vpop.f32.mrb[13].mxu0  ;;  %v534_v12 = vpop.f32.mrb[5].mxu1  ;;  %v620_v23 = vmul.f32 %v1263_v9, %v1588_v13  ;;  %v624_v44 = vmul.f32 %v1267_v10, %v1609_v36 }
 0x2f7   :  { %v1264_v17 = vpop.f32.mrb[14].mxu0  ;;  %v1268_v19 = vpop.f32.mrb[6].mxu1  ;;  %v618_v24 = vmul.f32 %v518_v11, %v1590_v16  ;;  %v622_v13 = vmul.f32 %v534_v12, %v1611_v37  ;;  %v1125_v37 = vld [vmem:[%s1797_s7] ss:$0 sm:$0xff] }
 0x2f8   :  { %v521_v21 = vpop.f32.mrb[15].mxu0  ;;  %v537_v22 = vpop.f32.mrb[7].mxu1  ;;  %v621_v26 = vmul.f32 %v1264_v17, %v1592_v18  ;;  %v625_v18 = vmul.f32 %v1268_v19, %v1613_v41 }
 0x2f9   :  { %v619_v31 = vmul.f32 %v521_v21, %v1596_v20  ;;  %v623_v20 = vmul.f32 %v537_v22, %v1618_v43 }
 0x2fd   :  { %v1273_v25 = vpop.f32.mrb[16].mxu0 }
 0x2fe   :  { %v628_v28 = vadd.f32 %v1273_v25, %v620_v23  ;;  %v587_v30 = vpop.f32.mrb[17].mxu0 }
 0x2ff   :  { %v626_v32 = vadd.f32 %v618_v24, %v587_v30  ;;  %v1274_v33 = vpop.f32.mrb[18].mxu0 }
 0x300   :  { %v629_v34 = vadd.f32 %v1274_v33, %v621_v26  ;;  %v590_v35 = vpop.f32.mrb[19].mxu0 }
 0x301   :  { %v627_v39 = vadd.f32 %v619_v31, %v590_v35 }
 0x302   :  { %v635_v40 = vpack.c.bf16 %v629_v34, %v628_v28 }
 0x303   :  { %v634_v42 = vpack.c.bf16 %v627_v39, %v626_v32 }
 0x305   :  { %v1277_v16 = vpop.f32.mrb[20].mxu0  ;;  %1283 = vmatprep.mubr.msk.bf16.mxu1 %vm661_vm13, %v634_v42 }
 0x306   :  { %v632_v45 = vadd.f32 %v1277_v16, %v624_v44  ;;  %v603_v46 = vpop.f32.mrb[21].mxu0  ;;  %1284 = vmatmul.mubr.msk.bf16.vlgmr.msra.gmra.mrb[8].mxu1 %vm661_vm13, %v635_v40 }
 0x307   :  { %v630_v48 = vadd.f32 %v622_v13, %v603_v46  ;;  %v1278_v49 = vpop.f32.mrb[22].mxu0 }
 0x308   :  { %v633_v50 = vadd.f32 %v1278_v49, %v625_v18  ;;  %v606_v51 = vpop.f32.mrb[23].mxu0 }
 0x309   :  { %v631_v53 = vadd.f32 %v623_v20, %v606_v51 }
 0x30a   :  { %v637_v54 = vpack.c.bf16 %v633_v50, %v632_v45  ;;  %v1134_v45 = vld [vmem:[%s1798_s8] ss:$0 sm:$0xff]  ;;  %s1454_s8 = smov [#allocation2]  }
 0x30b   :  { %v636_v36 = vpack.c.bf16 %v631_v53, %v630_v48 }
 0x30d   :  { %1287 = vmatprep.mubr.msk.bf16.mxu1 %vm661_vm13, %v636_v36 }
 0x30e   :  { %1288 = vmatmul.mubr.msk.bf16.gmra.mrb[12].mxu1 %vm661_vm13, %v637_v54 }
 0x30f   :  { %1326 = vmatprep.mubr.msk.f32.mxu1 %vm1452_vm1, %v1453_v15 }
 0x3d9   :  { %v1285_v41 = vpop.f32.mrb[8].mxu1 }
 0x3da   :  { %v708_v43 = vpop.f32.mrb[9].mxu1  ;;  %v717_v57 = vadd.f32 %v1285_v41, %v1125_v37 }
 0x3db   :  { %v709_v55 = vadd.f32 %v1125_v37, %v708_v43  ;;  %v1286_v56 = vpop.f32.mrb[10].mxu1 }
 0x3dc   :  { %v720_v58 = vadd.f32 %v1286_v56, %v1125_v37  ;;  %v711_v59 = vpop.f32.mrb[11].mxu1  ;;  %v1700_v0 = vmax.f32 %v717_v57, 0.0 }
 0x3dd   :  { %v1694_v60 = vmax.f32 %v709_v55, 0.0  ;;  %v712_v61 = vadd.f32 %v1125_v37, %v711_v59 }
 0x3de   :  { %v1696_v62 = vmax.f32 %v720_v58, 0.0  ;;  %v819_v9 = vmul.f32 %v1700_v0, %v1700_v0 }
 0x3df   :  { %v1698_v63 = vmax.f32 %v712_v61, 0.0  ;;  %v817_v15 = vmul.f32 %v1694_v60, %v1694_v60 }
 0x3e0   :  { %v820_v5 = vmul.f32 %v1696_v62, %v1696_v62  ;;  %v1377_v12 = vpack.c.bf16 %v1696_v62, %v1700_v0 }
 0x3e1   :  { %v1374_v1 = vpack.c.bf16 %v1698_v63, %v1694_v60  ;;  %v818_v2 = vmul.f32 %v1698_v63, %v1698_v63  ;;  %v1289_v3 = vpop.f32.mrb[12].mxu1 }
 0x3e2   :  { %v724_v4 = vpop.f32.mrb[13].mxu1  ;;  %v733_v17 = vadd.f32 %v1289_v3, %v1125_v37  ;;  %v1389_v24 = vpack.c.bf16 %v820_v5, %v819_v9 }
 0x3e3   :  { %v725_v6 = vadd.f32 %v1125_v37, %v724_v4  ;;  %v1290_v7 = vpop.f32.mrb[14].mxu1  ;;  %1375 = vmatpush3.bf16.msra.mxu0 %v1374_v1  ;;  %v1386_v8 = vpack.c.bf16 %v818_v2, %v817_v15 }
 0x3e4   :  { %v736_v10 = vadd.f32 %v1290_v7, %v1125_v37  ;;  %v727_v11 = vpop.f32.mrb[15].mxu1  ;;  %1376 = vmatprep.subr.bf16.mxu0 %v1451_v14  ;;  %v1723_v25 = vmax.f32 %v733_v17, 0.0 }
 0x3e5   :  { %v1715_v19 = vmax.f32 %v725_v6, 0.0  ;;  %v728_v21 = vadd.f32 %v1125_v37, %v727_v11  ;;  %1387 = vmatpush3.bf16.msra.mxu1 %v1386_v8 }
 0x3e6   :  { %1388 = vmatprep.subr.bf16.mxu1 %v1451_v14  ;;  %v1718_v22 = vmax.f32 %v736_v10, 0.0  ;;  %v823_v33 = vmul.f32 %v1723_v25, %v1723_v25 }
 0x3e7   :  { %v1720_v23 = vmax.f32 %v728_v21, 0.0  ;;  %1378 = vmatpush3.bf16.msra.mxu0 %v1377_v12  ;;  %v821_v26 = vmul.f32 %v1715_v19, %v1715_v19 }
 0x3e8   :  { %1379 = vmatprep.subr.bf16.mxu0 %v1451_v14  ;;  %v824_v31 = vmul.f32 %v1718_v22, %v1718_v22  ;;  %v1383_v34 = vpack.c.bf16 %v1718_v22, %v1723_v25 }
 0x3e9   :  { %v1380_v28 = vpack.c.bf16 %v1720_v23, %v1715_v19  ;;  %v822_v30 = vmul.f32 %v1720_v23, %v1720_v23  ;;  %1390 = vmatpush3.bf16.msra.mxu1 %v1389_v24 }
 0x3ea   :  { %1391 = vmatprep.subr.bf16.mxu1 %v1451_v14  ;;  %v1395_v35 = vpack.c.bf16 %v824_v31, %v823_v33 }
 0x3eb   :  { %1381 = vmatpush3.bf16.msra.mxu0 %v1380_v28  ;;  %v1392_v32 = vpack.c.bf16 %v822_v30, %v821_v26 }
 0x3ec   :  { %1382 = vmatprep.subr.bf16.mxu0 %v1451_v14 }
 0x3ed   :  { %1393 = vmatpush3.bf16.msra.mxu1 %v1392_v32 }
 0x3ee   :  { %1394 = vmatprep.subr.bf16.mxu1 %v1451_v14 }
 0x3ef   :  { %1384 = vmatpush3.bf16.msra.mxu0 %v1383_v34 }
 0x3f1   :  { %1396 = vmatpush3.bf16.msra.mxu1 %v1395_v35 }
 0x3f2   :  { %1308 = vmatmul.mubr.msk.f32.vlgmr.msra.gmra.mrb[10].mxu0 %vm293_vm11, %v1634_v52 }
 0x3f3   :  { %1331 = vmatprep.mubr.msk.bf16.mxu0 %vm95_vm4, %v1569_v29 }
 0x3f4   :  { %1327 = vmatmul.mubr.msk.f32.vlgmr.msra.gmra.mrb[2].mxu1 %vm293_vm11, %v1634_v52  ;;  %v1135_v52 = vld [vmem:[%s1799_s9] ss:$0 sm:$0xff]  ;;  %s1084_s9 = sshll.u32 %s1454_s8, 4  ;;  %s1085_s9 = int_to_ptr.vmem [resolvable:$true] %s1084_s9 }
 0x3f5   :  { %1341 = vmatprep.mubr.msk.bf16.mxu1 %vm95_vm4, %v1569_v29  ;;  %s1426_s27 = scalar_lea.vmem %s1085_s9, 1024  ;;  %p1431_p1 = scmp.lt.s32.totalorder %s1085_s9, %s1085_s9 }
 0x3f6   :  { %p1427_p0 = scmp.ne.s32.totalorder %s1085_s9, %s1426_s27  ;;  %p1432_p2 = scmp.lt.s32.totalorder %s1426_s27, %s1426_s27 }
 0x3f8   :  { %p1433_p3 = por %p1432_p2, %p1431_p1 }
 0x3fa   :  { %p1434_p4 = pnand %p1433_p3, %p1427_p0 }
 0x4c5   :  { %v813_v39 = vpop.f32.mrb[10].mxu0 }
 0x4c6   :  { %v895_v40 = vmul.f32 %v813_v39, %v813_v39  ;;  %v1309_v42 = vpop.f32.mrb[11].mxu0 }
 0x4c7   :  { %v891_v44 = vpop.f32.mrb[2].mxu1 }
 0x4c8   :  { %v896_v14 = vsub.f32 %v891_v44, %v895_v40  ;;  %v1328_v13 = vpop.f32.mrb[3].mxu1 }
 0x4ca   :  { %v897_v16 = vmax.f32 %v896_v14, 0.0 }
 0x4cc   :  { %v898_v18 = vadd.f32 1e-05, %v897_v16 }
 0x4ce   :  { %1424 = vrsqrt.f32 %v898_v18 }
 0x4d8   :  { %v1425_v46 = vpop.eup %1424 }
 0x4d9   :  { %v907_v20 = vmul.f32 %v1425_v46, %v1134_v45 }
 0x4db   :  { %v917_v29 = vpack.c.bf16 %v907_v20, %v907_v20  ;;  %v909_v48 = vmul.f32 %v907_v20, %v813_v39 }
 0x4dd   :  { %1402 = vmatprep.subr.msk.bf16.mxu0 %vm480_vm12, %v917_v29  ;;  %v919_v49 = vsel %vm480_vm12, %v917_v29, 0  ;;  %v916_v50 = vsub.f32 %v1135_v52, %v909_v48 }
 0x4de   :  { %1330 = vmatpush3.bf16.msra.mxu0 %v919_v49 }
 0x4df   :  { %v986_v51 = vpack.c.bf16 %v916_v50, %v916_v50 }
 0x4e1   :  { %1332 = vmatmul.mubr.msk.bf16.vlgmr.msra.gmra.mrb[24].mxu0 %vm95_vm4, %v1566_v27  ;;  %1403 = vmatprep.subr.msk.bf16.mxu1 %vm480_vm12, %v986_v51  ;;  %v988_v53 = vsel %vm480_vm12, %v986_v51, 0 }
 0x4e2   :  { %1335 = vmatprep.mubr.msk.bf16.mxu0 %vm95_vm4, %v1575_v38  ;;  %1340 = vmatpush3.bf16.msra.mxu1 %v988_v53 }
 0x4e5   :  { %1342 = vmatmul.mubr.msk.bf16.vlgmr.msra.gmra.mrb[16].mxu1 %vm95_vm4, %v1566_v27 }
 0x4e6   :  { %1345 = vmatprep.mubr.msk.bf16.mxu1 %vm95_vm4, %v1575_v38 }
 0x4e9   :  { %1336 = vmatmul.mubr.msk.bf16.gmra.mrb[28].mxu0 %vm95_vm4, %v1581_v47 }
 0x4ed   :  { %1346 = vmatmul.mubr.msk.bf16.gmra.mrb[20].mxu1 %vm95_vm4, %v1581_v47 }
 0x5b4   :  { %v1333_v54 = vpop.f32.mrb[24].mxu0 }
 0x5b5   :  { %v955_v36 = vpop.f32.mrb[25].mxu0  ;;  %v1057_v41 = vmul.f32 %v1333_v54, %v1700_v0 }
 0x5b6   :  { %v1334_v37 = vpop.f32.mrb[26].mxu0  ;;  %v1055_v55 = vmul.f32 %v955_v36, %v1694_v60 }
 0x5b7   :  { %v958_v43 = vpop.f32.mrb[27].mxu0  ;;  %v1058_v27 = vmul.f32 %v1334_v37, %v1696_v62 }
 0x5b8   :  { %v1343_v56 = vpop.f32.mrb[16].mxu1  ;;  %v1056_v38 = vmul.f32 %v958_v43, %v1698_v63 }
 0x5b9   :  { %v1065_v57 = vadd.f32 %v1343_v56, %v1057_v41  ;;  %v1024_v58 = vpop.f32.mrb[17].mxu1 }
 0x5ba   :  { %v1063_v59 = vadd.f32 %v1055_v55, %v1024_v58  ;;  %v1344_v61 = vpop.f32.mrb[18].mxu1 }
 0x5bb   :  { %1073 = vst [vmem:[#allocation2 + $0x10] sm:$0xff] %v1065_v57  ;;  %v1066_v15 = vadd.f32 %v1344_v61, %v1058_v27  ;;  %v1027_v47 = vpop.f32.mrb[19].mxu1 }
 0x5bc   :  { %1071 = vst [vmem:[#allocation2] sm:$0xff] %v1063_v59  ;;  %v1064_v1 = vadd.f32 %v1056_v38, %v1027_v47  ;;  %v1337_v2 = vpop.f32.mrb[28].mxu0 }
 0x5bd   :  { %1074 = vst [vmem:[#allocation2 + $0x18] sm:$0xff] %v1066_v15  ;;  %v971_v0 = vpop.f32.mrb[29].mxu0  ;;  %v1061_v60 = vmul.f32 %v1337_v2, %v1723_v25 }
 0x5be   :  { %1072 = vst [vmem:[#allocation2 + $0x8] sm:$0xff] %v1064_v1  ;;  %v1338_v3 = vpop.f32.mrb[30].mxu0  ;;  %v1059_v62 = vmul.f32 %v971_v0, %v1715_v19 }
 0x5bf   :  { %v974_v4 = vpop.f32.mrb[31].mxu0  ;;  %v1062_v63 = vmul.f32 %v1338_v3, %v1718_v22 }
 0x5c0   :  { %v1347_v5 = vpop.f32.mrb[20].mxu1  ;;  %v1060_v8 = vmul.f32 %v974_v4, %v1720_v23 }
 0x5c1   :  { %v1069_v6 = vadd.f32 %v1347_v5, %v1061_v60  ;;  %v1040_v7 = vpop.f32.mrb[21].mxu1 }
 0x5c2   :  { %v1067_v9 = vadd.f32 %v1059_v62, %v1040_v7  ;;  %v1348_v10 = vpop.f32.mrb[22].mxu1 }
 0x5c3   :  { %1077 = vst [vmem:[#allocation2 + $0x30] sm:$0xff] %v1069_v6  ;;  %v1070_v11 = vadd.f32 %v1348_v10, %v1062_v63  ;;  %v1043_v12 = vpop.f32.mrb[23].mxu1 }
 0x5c4   :  { %1075 = vst [vmem:[#allocation2 + $0x20] sm:$0xff] %v1067_v9  ;;  %v1068_v17 = vadd.f32 %v1060_v8, %v1043_v12 }
 0x5c5   :  { %1078 = vst [vmem:[#allocation2 + $0x38] sm:$0xff] %v1070_v11 }
 0x5c6   :  { %1076 = vst [vmem:[#allocation2 + $0x28] sm:$0xff] %v1068_v17 }
 0x5c7   :  { %1437 = shalt.err (!%p1434_p4)
}
 0x5c8   :  { %s1438_s30 = scalar_lea.hbm %s1800_s10, 1024 }
 0x5c9   :  { %p1439_p5 = scmp.ne.s32.totalorder %s1800_s10, %s1438_s30  ;;  %p1442_p6 = scmp.lt.u32.totalorder %s1438_s30, %s1800_s10 }
 0x5cb   :  { %p1444_p7 = pnand %p1442_p6, %p1439_p5 }
 0x5cd   :  { %1447 = shalt.err (!%p1444_p7)
}
 0x5ce   :  { %s1455_s14 = smov 128   ;;  %s1456_s15 = smov 8  }
 0x5cf   :  { %1090 = dma.vmem_to_hbm [thread:$0]  %s1085_s9, 1024, %s1800_s10, [#allocation3], %s1455_s14, %s1455_s14, %s1456_s15  }
 0x5d0   :  { %1448 = dma.done.wait [#allocation3], 1024  }
 0x5d1   :  { %1449 = vsyncadd [#allocation3], 4294966272 }
 0x5d2   :  { %1094 = vsyncpa [#allocation3], 1 }

</bundles_post_ra>
